<compile_context>
chip_gen: v7x
topology: tpu7x:2x2x1
jax: 0.10.0
libtpu: 0.0.40
codegen_flags: <defaults>
</compile_context>

<pallas_src>
import math
from functools import partial

import jax
import jax.numpy as jnp
from jax.experimental import pallas as pl
from jax.experimental.pallas import tpu as pltpu


def _round_up(x, m):
    return ((x + m - 1) // m) * m


# --------------------------------------------------------------------------- #
# Pallas kernel: patch-tile @ W + b  (+ optional LayerNorm over embed dim)
# --------------------------------------------------------------------------- #
def _embed_kernel(p_ref, w_ref, pb_ref, o_ref, *, normalize, eps, e_real, e_pad):
    # p_ref : (tm, K)  bf16 patch tile
    # w_ref : (K, Ep)  bf16 weight matrix (resident across the grid)
    # pb_ref: (8, Ep)  f32 packed params: row0=bias, row1=gamma, row2=beta
    # o_ref : (tm, Ep) f32 output tile
    acc = jnp.dot(p_ref[...], w_ref[...], preferred_element_type=jnp.float32)
    acc = acc + pb_ref[0:1, :]                       # bias (f32)
    if normalize:
        inv_e = 1.0 / float(e_real)
        mean = jnp.sum(acc, axis=-1, keepdims=True) * inv_e
        centered = acc - mean
        if e_pad != e_real:
            # Padded embed columns of acc are exactly 0 (zero-padded W and bias),
            # so the sum above is already correct; mask them so they do not
            # pollute the variance.
            col = jax.lax.broadcasted_iota(jnp.int32, (1, e_pad), 1)
            centered = jnp.where(col < e_real, centered, 0.0)
        var = jnp.sum(centered * centered, axis=-1, keepdims=True) * inv_e
        acc = centered * jax.lax.rsqrt(var + eps)
        acc = acc * pb_ref[1:2, :] + pb_ref[2:3, :]  # gamma, beta
    o_ref[...] = acc.astype(o_ref.dtype)


# --------------------------------------------------------------------------- #
# im2col (XLA glue in the wrapper)
# --------------------------------------------------------------------------- #
def _im2col_nchw(x_nchw, patch_size, stride, pad):
    """Extract overlapping patches. Returns [N, H_out*W_out, p*p*C] (kh,kw,c order)."""
    # TODO(synk): fuse this extraction into the kernel (pl.ANY HBM ref + manual
    # DMA of overlapping row bands) so the ~p^2/stride^2-expanded patch matrix
    # is never materialized in HBM.
    x = jnp.transpose(x_nchw, (0, 2, 3, 1))  # NHWC
    N, H, W, C = x.shape
    xp = jnp.pad(x, ((0, 0), (pad, pad), (pad, pad), (0, 0)))
    H_out = (H + 2 * pad - patch_size) // stride + 1
    W_out = (W + 2 * pad - patch_size) // stride + 1
    cols = []
    for kh in range(patch_size):
        for kw in range(patch_size):
            cols.append(
                xp[:, kh:kh + (H_out - 1) * stride + 1:stride,
                      kw:kw + (W_out - 1) * stride + 1:stride, :]
            )  # [N, H_out, W_out, C]
    patches = jnp.stack(cols, axis=3)  # [N, H_out, W_out, p*p, C]
    return patches.reshape(N, H_out * W_out, patch_size * patch_size * C)


def _choose_tm(M, target=512):
    """Large token tile; prefer a divisor of M (avoids the row-pad copy), keep
    the grid length >= 2 so both v7x TensorCores get work."""
    if M <= 2 * target:
        half = -(-M // 2)                      # ceil(M/2) -> 2 grid steps
        return max(8, _round_up(half, 8))
    for cand in range(target, target // 2 - 1, -8):
        if M % cand == 0:
            return cand
    return target


# --------------------------------------------------------------------------- #
# Forward wrapper
# --------------------------------------------------------------------------- #
@partial(jax.jit,
         static_argnames=("patch_size", "stride", "normalization", "tm", "ln_eps"))
def _op_embedder_core(x_nchw, conv_w, conv_b, ln_w, ln_b, *, patch_size, stride,
                      normalization, tm, ln_eps):
    N, C, H, W = x_nchw.shape
    E = conv_w.shape[0]
    pad = patch_size // 2

    patches = _im2col_nchw(x_nchw, patch_size, stride, pad)
    L = patches.shape[1]
    K = patch_size * patch_size * C
    M = N * L

    if tm is None:
        tm = _choose_tm(M)
    Mp = _round_up(M, tm)
    Ep = _round_up(E, 128)   # lane-dense output -> unmasked stores

    # Matmul operands in bf16 (mem-bound); accumulate in f32 on the MXU.
    p_flat = patches.reshape(M, K).astype(jnp.bfloat16)
    if Mp != M:
        p_flat = jnp.pad(p_flat, ((0, Mp - M), (0, 0)))

    # Conv weight [E, C, p, p] -> [p, p, C, E] -> [K, E] to match patch order.
    w_mat = jnp.transpose(conv_w, (2, 3, 1, 0)).reshape(K, E)
    if Ep != E:
        w_mat = jnp.pad(w_mat, ((0, 0), (0, Ep - E)))
    w_mat = w_mat.astype(jnp.bfloat16)

    # One small packed param block instead of three separate (1, E) inputs.
    pb = jnp.zeros((8, Ep), jnp.float32)
    pb = pb.at[0, :E].set(conv_b.astype(jnp.float32))
    pb = pb.at[1, :E].set(ln_w.astype(jnp.float32))
    pb = pb.at[2, :E].set(ln_b.astype(jnp.float32))

    kernel = partial(_embed_kernel, normalize=bool(normalization),
                     eps=float(ln_eps), e_real=E, e_pad=Ep)

    # Explicit (conservative) VMEM budget: double-buffered tiles + weight + params.
    vmem_need = 2 * (tm * K * 2 + K * Ep * 2 + tm * Ep * 4 + 8 * Ep * 4)
    vmem_limit = int(min(max(4 * vmem_need, 8 * 1024 * 1024), 48 * 1024 * 1024))

    out = pl.pallas_call(
        kernel,
        out_shape=jax.ShapeDtypeStruct((Mp, Ep), jnp.float32),
        grid=(Mp // tm,),
        in_specs=[
            pl.BlockSpec((tm, K), lambda i: (i, 0)),   # patch tile (bf16)
            pl.BlockSpec((K, Ep), lambda i: (0, 0)),   # weight, resident
            pl.BlockSpec((8, Ep), lambda i: (0, 0)),   # packed bias/gamma/beta
        ],
        out_specs=pl.BlockSpec((tm, Ep), lambda i: (i, 0)),
        compiler_params=pltpu.CompilerParams(
            dimension_semantics=("parallel",),
            vmem_limit_bytes=vmem_limit,
        ),
    )(p_flat, w_mat, pb)

    return out[:M, :E].reshape(N, L, E)


def op_embedder_forward(x_nchw, conv_w, conv_b, ln_w, ln_b, patch_size, stride,
                        normalization=False, *, tm=None, ln_eps=1e-5):
    """Forward pass of OPEmbedder.

    x_nchw : [N, C, H, W] float32
    conv_w : [E, C, p, p]  (PyTorch Conv2d layout)
    conv_b, ln_w, ln_b : [E]
    Returns (tokens [N, H_out*W_out, E], H_out, W_out).
    """
    _, _, H, W = x_nchw.shape
    pad = patch_size // 2
    H_out = (H + 2 * pad - patch_size) // stride + 1
    W_out = (W + 2 * pad - patch_size) // stride + 1
    tokens = _op_embedder_core(x_nchw, conv_w, conv_b, ln_w, ln_b,
                               patch_size=patch_size, stride=stride,
                               normalization=bool(normalization),
                               tm=tm, ln_eps=float(ln_eps))
    return tokens, H_out, W_out


# --------------------------------------------------------------------------- #
# Pure-JAX reference (conv via lax) for sanity check
# --------------------------------------------------------------------------- #
def _reference(x_nchw, conv_w, conv_b, ln_w, ln_b, patch_size, stride,
               normalization=False, ln_eps=1e-5):
    pad = patch_size // 2
    y = jax.lax.conv_general_dilated(
        x_nchw, conv_w,
        window_strides=(stride, stride),
        padding=((pad, pad), (pad, pad)),
        dimension_numbers=("NCHW", "OIHW", "NCHW"),
    ) + conv_b[None, :, None, None]
    N, Cc, Ho, Wo = y.shape
    tok = jnp.transpose(y.reshape(N, Cc, Ho * Wo), (0, 2, 1))
    if normalization:
        mean = tok.mean(-1, keepdims=True)
        var = ((tok - mean) ** 2).mean(-1, keepdims=True)
        tok = (tok - mean) * jax.lax.rsqrt(var + ln_eps) * ln_w + ln_b
    return tok, Ho, Wo


if __name__ == "__main__":
    key = jax.random.PRNGKey(0)

    # Small shapes consistent with the module's forward.
    N, C, H, W = 2, 3, 16, 16
    patch_size, stride, embed_dim = 7, 4, 32

    k_x, k_w = jax.random.split(key)
    x = jax.random.normal(k_x, (N, C, H, W), dtype=jnp.float32)

    # Deterministic parameter init mirroring OPEmbedder.init_weights:
    #   Conv2d: normal(0, sqrt(2 / (k*k*out_channels))), bias = 0
    #   LayerNorm: weight = 1, bias = 0
    fan_out = patch_size * patch_size * embed_dim
    conv_w = (math.sqrt(2.0 / fan_out)
              * jax.random.normal(k_w, (embed_dim, C, patch_size, patch_size),
                                  dtype=jnp.float32))
    conv_b = jnp.zeros((embed_dim,), dtype=jnp.float32)
    ln_w = jnp.ones((embed_dim,), dtype=jnp.float32)
    ln_b = jnp.zeros((embed_dim,), dtype=jnp.float32)

    # Default path (normalization=False), matching forward()'s default.
    tokens, Ho, Wo = op_embedder_forward(x, conv_w, conv_b, ln_w, ln_b,
                                         patch_size, stride, normalization=False)
    jax.block_until_ready(tokens)

    ref_tokens, rHo, rWo = _reference(x, conv_w, conv_b, ln_w, ln_b,
                                      patch_size, stride, normalization=False)
    assert (Ho, Wo) == (rHo, rWo)
    assert tokens.shape == (N, Ho * Wo, embed_dim)
    # bf16 matmul inputs (f32 accumulation) -> slightly looser tolerance than f32.
    assert jnp.allclose(tokens, ref_tokens, atol=3e-2, rtol=3e-2)

    # Also exercise the LayerNorm path (hits the lane-padded E + masked-var code).
    tokens_n, _, _ = op_embedder_forward(x, conv_w, conv_b, ln_w, ln_b,
                                         patch_size, stride, normalization=True)
    jax.block_until_ready(tokens_n)
    ref_tokens_n, _, _ = _reference(x, conv_w, conv_b, ln_w, ln_b,
                                    patch_size, stride, normalization=True)
    assert jnp.allclose(tokens_n, ref_tokens_n, atol=3e-2, rtol=3e-2)

    print("KERNEL_OK")
</pallas_src>

<mosaic_0001>
module attributes {stable_mosaic.version = 11 : i64} {
  func.func @_embed_kernel(%arg0: i32, %arg1: memref<16x147xbf16, #tpu.memory_space<vmem>>, %arg2: memref<147x128xbf16, #tpu.memory_space<vmem>>, %arg3: memref<8x128xf32, #tpu.memory_space<vmem>>, %arg4: memref<16x128xf32, #tpu.memory_space<vmem>>) attributes {dimension_semantics = [#tpu.dimension_semantics<parallel>], iteration_bounds = array<i64: 2>, scalar_prefetch = 0 : i64, scratch_operands = 0 : i64, tpu.core_type = #tpu.core_type<tc>, window_params = [{transform_indices = @transform_0, window_bounds = array<i64: 16, 147>}, {pipeline_mode = #tpu.pipeline_mode<synchronous>, transform_indices = @transform_1, window_bounds = array<i64: 147, 128>}, {pipeline_mode = #tpu.pipeline_mode<synchronous>, transform_indices = @transform_2, window_bounds = array<i64: 8, 128>}, {transform_indices = @transform_3, window_bounds = array<i64: 16, 128>}]} {
    %c0 = arith.constant 0 : index
    %c0_0 = arith.constant 0 : index
    %0 = vector.load %arg1[%c0, %c0_0] : memref<16x147xbf16, #tpu.memory_space<vmem>>, vector<16x147xbf16>
    %c0_1 = arith.constant 0 : index
    %c0_2 = arith.constant 0 : index
    %1 = vector.load %arg2[%c0_1, %c0_2] : memref<147x128xbf16, #tpu.memory_space<vmem>>, vector<147x128xbf16>
    %cst = arith.constant dense<0.000000e+00> : vector<16x128xf32>
    %2 = tpu.matmul %0, %1, %cst {dimension_numbers = #tpu.dot_dimension_numbers<[1], [0], [0], [1], [0, 0, 1, 1], [], []>} : vector<16x147xbf16>, vector<147x128xbf16>, vector<16x128xf32> -> vector<16x128xf32>
    %c0_3 = arith.constant 0 : index
    %c0_4 = arith.constant 0 : index
    %3 = vector.load %arg3[%c0_3, %c0_4] : memref<8x128xf32, #tpu.memory_space<vmem>>, vector<1x128xf32>
    %4 = vector.broadcast %3 : vector<1x128xf32> to vector<16x128xf32>
    %5 = arith.addf %2, %4 : vector<16x128xf32>
    %c0_5 = arith.constant 0 : index
    %c0_6 = arith.constant 0 : index
    %6 = vector.load %arg4[%c0_5, %c0_6] : memref<16x128xf32, #tpu.memory_space<vmem>>, vector<16x128xf32>
    tpu.vector_store %arg4[%c0_5, %c0_6], %5 {strides = array<i32>} : memref<16x128xf32, #tpu.memory_space<vmem>>, vector<16x128xf32>,
    return
  }
  func.func @transform_0(%arg0: i32) -> (i32, i32) {
    %c0_i32 = arith.constant 0 : i32
    %c0_i32_0 = arith.constant 0 : i32
    return %arg0, %c0_i32 : i32, i32
  }
  func.func @transform_1(%arg0: i32) -> (i32, i32) {
    %c0_i32 = arith.constant 0 : i32
    %c0_i32_0 = arith.constant 0 : i32
    %c0_i32_1 = arith.constant 0 : i32
    return %c0_i32, %c0_i32_0 : i32, i32
  }
  func.func @transform_2(%arg0: i32) -> (i32, i32) {
    %c0_i32 = arith.constant 0 : i32
    %c0_i32_0 = arith.constant 0 : i32
    %c0_i32_1 = arith.constant 0 : i32
    return %c0_i32, %c0_i32_0 : i32, i32
  }
  func.func @transform_3(%arg0: i32) -> (i32, i32) {
    %c0_i32 = arith.constant 0 : i32
    %c0_i32_0 = arith.constant 0 : i32
    return %arg0, %c0_i32 : i32, i32
  }
}

</mosaic_0001>

<bundles_post_ra>
// kernel: _op_embedder_core.1
= control target key start
LH: loop header
LB: loop body
LE: loop exit
PB: predicated region body
PF: predicated region fallthrough
CT: control target
= control target key end

     0   :  { %8 = vsyncpa [#allocation3], 0  ;;  %s707_s0 = inlined_call_operand.vmem [shape: bf16[32,147], index: 0, kind: input, shape index: {}]   ;;  %s708_s1 = inlined_call_operand.vmem [shape: bf16[147,128], index: 1, kind: input, shape index: {}]   ;;  %s709_s2 = inlined_call_operand.vmem [shape: f32[8,128], index: 2, kind: input, shape index: {}]   ;;  %s710_s3 = inlined_call_operand.hbm [shape: f32[32,128], index: 3, kind: output, shape index: {}]  }
   0x1   :  { %10 = vsyncpa [#allocation3 + $0x1], 0  ;;  %s572_s12 = smov 0   ;;  %s574_s13 = smov 0  }
   0x2   :  { %s576_s14 = smov 0   ;;  %s578_s15 = smov 0  }
   0x3 LB: > { %s593_s16 = sadd.s32 4294967295, %s545_s15   ;;  %s398_s17 = sadd.s32 4294967294, %s545_s15   ;;  %s545_s15 = sphi %s578_s15, %s716_s15   ;;  %s541_s14 = sphi %s576_s14, %s715_s14   ;;  %s537_s13 = sphi %s574_s13, %s714_s13   ;;  %s533_s12 = sphi %s572_s12, %s713_s12  }
   0x4   : > { %s597_s18 = sadd.s32 1, %s545_s15   ;;  %s91_s19 = sadd.s32 1, %s541_s14 }
   0x5   : > { %s88_s20 = ssub.s32 %s545_s15, %s597_s18  ;;  %p101_p0 = scmp.ne.s32.totalorder %s541_s14, %s537_s13 }
   0x6   : > { %p89_p1 = scmp.eq.s32.totalorder %s88_s20, 0  ;;  %p102_p2 = scmp.eq.s32.totalorder %s593_s16, 1 }
   0x7   : > { %p107_p3 = scmp.ne.s32.totalorder %s537_s13, %s533_s12  ;;  %p108_p4 = scmp.eq.s32.totalorder %s398_s17, 1 }
   0x8   : > { %s608_s21 = scalar_select %p89_p1, %s541_s14, %s91_s19  }
   0x9   : > { %p610_p5 = por %p102_p2, %p101_p0  ;;  %p614_p6 = por %p108_p4, %p107_p3 }
   0xa   : > { %p401_p7 = scmp.ge.s32.totalorder %s545_s15, 1  ;;  %p142_p8 = scmp.lt.s32.totalorder %s545_s15, 3 }
   0xc   : > { %p143_p9 = pnand %p401_p7, %p142_p8 }
   0xd   : > { %v470_v0 = vld [vmem:[%s708_s1] sm:$0xff] (!%p143_p9)   ;;  %v547_v1 = vmov (!%p143_p9), 0   ;;  %v471_v2 = vld [vmem:[%s708_s1 + $0x8] sm:$0xff] (!%p143_p9)   ;;  %v472_v3 = vld [vmem:[%s708_s1 + $0x10] sm:$0xff] (!%p143_p9)   ;;  %s403_s30 = sshll.u32 (!%p143_p9), %s593_s16, 1  ;;  %vm268_vm0 = vcmask (!%p143_p9), 154624  }
   0xe   : > { %146 = sbr.rel (%p143_p9) target bundleno = 285 (0x11d), region = 32  ;;  %279 = vmatprep.subr.bf16.mxu0 (!%p143_p9), %v547_v1  ;;  %p168_p10 = scmp.lt.s32.totalorder (!%p143_p9), %s403_s30, 3  ;;  %v473_v4 = vld [vmem:[%s708_s1 + $0x18] sm:$0xff] (!%p143_p9)   ;;  %v474_v5 = vld [vmem:[%s708_s1 + $0x20] sm:$0xff] (!%p143_p9)   ;;  %v475_v7 = vld [vmem:[%s708_s1 + $0x28] sm:$0xff] (!%p143_p9)   ;;  %vm272_vm1 = vcmask (!%p143_p9), 1040384  }
   0xf   : > { %280 = vmatpush1.bf16.msra.mxu0 (!%p143_p9), %v470_v0  ;;  %v476_v8 = vld [vmem:[%s708_s1 + $0x30] sm:$0xff] (!%p143_p9)   ;;  %v477_v9 = vld [vmem:[%s708_s1 + $0x38] sm:$0xff] (!%p143_p9)   ;;  %vm273_vm2 = vcmask (!%p143_p9), 1041408   ;;  %v548_v10 = vmov (!%p143_p9), 65535   ;;  %v478_v12 = vld [vmem:[%s708_s1 + $0x40] sm:$0xff] (!%p143_p9)   ;;  %s164_s4 = sand.u32 (!%p143_p9), 1, %s537_s13  }
  0x10   : > { %281 = vmatprep.subr.bf16.mxu0 (!%p143_p9), %v547_v1  ;;  %v274_v11 = vsel (!%p143_p9), %vm272_vm1, 4294967295, %v548_v10  ;;  %v479_v13 = vld [vmem:[%s708_s1 + $0x48] ss:$0 sps:$4 sm:$0x33] (!%p143_p9)   ;;  %s402_s5 = sshll.u32 (!%p143_p9), %s164_s4, 4  ;;  %s426_s11 = sshll.u32 (!%p143_p9), %s593_s16, 8 }
  0x11   : > { %v275_v14 = vsel (!%p143_p9), %vm273_vm2, %v274_v11, 0  ;;  %v406_v17 = vld [vmem:[%s709_s2] ss:$0 sm:$0xff] (!%p143_p9)  ;;  %s166_s8 = scalar_lea.vmem (!%p143_p9), [#allocation2], %s402_s5  ;;  %s664_s19 = scalar_lea.hbm (!%p143_p9), %s710_s3, %s426_s11 }
  0x12   : > { %v277_v15 = vand.u32 (!%p143_p9), %v479_v13, %v275_v14  ;;  %s336_s10 = sshll.u32 (!%p143_p9), %s166_s8, 4  ;;  %s666_s20 = scalar_lea.sflag (!%p143_p9), [#allocation3], %s164_s4  ;;  %s659_s10 = int_to_ptr.vmem [resolvable:$true] %s336_s10 }
  0x13   : > { %282 = vmatpush1.bf16.msra.mxu0 (!%p143_p9), %v471_v2  ;;  %s483_s16 = scalar_lea.vmem (!%p143_p9), %s659_s10, 256  ;;  %s549_s24 = smov (!%p143_p9), [#allocation2]  }
  0x14   : > { %283 = vmatprep.subr.bf16.mxu0 (!%p143_p9), %v547_v1  ;;  %p484_p11 = scmp.ne.s32.totalorder (!%p143_p9), %s659_s10, %s483_s16  ;;  %s487_s25 = sshll.u32 (!%p143_p9), %s549_s24, 4  ;;  %s488_s25 = int_to_ptr.vmem [resolvable:$false] %s487_s25 }
  0x15   : > { %s718_s30 = smov (!%p168_p10, %s403_s30), 3  ;;  %s489_s26 = scalar_lea.vmem %s488_s25, 512 }
  0x16   : > { %s425_s6 = sshll.u32 %s718_s30, 3  ;;  %p485_p12 = pnand %p484_p11, %p610_p5 }
  0x17   : > { %284 = vmatpush1.bf16.msra.mxu0 %v472_v3  ;;  %s172_s9 = scalar_lea.vmem %s707_s0, %s425_s6  ;;  %p490_p0 = scmp.lt.s32.totalorder %s659_s10, %s488_s25 }
  0x18   : > { %285 = vmatprep.subr.bf16.mxu0 %v547_v1  ;;  %v482_v6 = vld [vmem:[%s172_s9 + $0x4] ss:$8 sps:$4 sm:$0xff]   ;;  %v480_v16 = vld [vmem:[%s172_s9] ss:$8 sps:$4 sm:$0xff]   ;;  %p486_p13 = pneg %p485_p12  ;;  %p491_p1 = scmp.lt.s32.totalorder %s489_s26, %s483_s16 }
  0x19   : > { %419 = vmatprep.mubr.msk.bf16.mxu0 %vm268_vm0, %v482_v6 }
  0x1a   : > { %p492_p2 = por %p491_p1, %p490_p0 }
  0x1b   : > { %286 = vmatpush1.bf16.msra.mxu0 %v473_v4 }
  0x1c   : > { %287 = vmatprep.subr.bf16.mxu0 %v547_v1  ;;  %p493_p3 = pnand %p492_p2, %p486_p13 }
  0x1f   : > { %288 = vmatpush1.bf16.msra.mxu0 %v474_v5 }
  0x20   : > { %289 = vmatprep.subr.bf16.mxu0 %v547_v1 }
  0x23   : > { %290 = vmatpush1.bf16.msra.mxu0 %v475_v7 }
  0x24   : > { %291 = vmatprep.subr.bf16.mxu0 %v547_v1 }
  0x27   : > { %292 = vmatpush1.bf16.msra.mxu0 %v476_v8 }
  0x28   : > { %293 = vmatprep.subr.bf16.mxu0 %v547_v1 }
  0x2b   : > { %294 = vmatpush1.bf16.msra.mxu0 %v477_v9 }
  0x2c   : > { %295 = vmatprep.subr.bf16.mxu0 %v547_v1 }
  0x2f   : > { %296 = vmatpush1.bf16.msra.mxu0 %v478_v12 }
  0x30   : > { %297 = vmatprep.subr.bf16.mxu0 %v547_v1 }
  0x33   : > { %298 = vmatpush1.bf16.msra.mxu0 %v277_v15 }
  0x36   : > { %312 = vmatmul.mubr.bf16.vlgmr.msra.gmra.mrb[0].mxu0 %v480_v16 }
 0x109   : > { %v313_v18 = vpop.f32.mrb[0].mxu0 }
 0x10a   : > { %v314_v19 = vadd.f32 %v406_v17, %v313_v18  ;;  %v315_v20 = vpop.f32.mrb[1].mxu0 }
 0x10b   : > { %v316_v21 = vpop.f32.mrb[2].mxu0 }
 0x10c   : > { %320 = vst [vmem:[%s166_s8] sm:$0xff] %v314_v19  ;;  %v317_v22 = vadd.f32 %v406_v17, %v316_v21  ;;  %v318_v23 = vpop.f32.mrb[3].mxu0 }
 0x10e   : > { %321 = vst [vmem:[%s166_s8 + $0x8] sm:$0xff] %v317_v22 }
 0x10f   : > { %496 = shalt.err (!%p493_p3)
}
 0x110   : > { %s497_s27 = scalar_lea.hbm %s664_s19, 256  ;;  %s501_s30 = scalar_lea.hbm %s710_s3, 512 }
 0x111   : > { %p498_p4 = scmp.ne.s32.totalorder %s664_s19, %s497_s27  ;;  %p502_p9 = scmp.lt.u32.totalorder %s664_s19, %s710_s3 }
 0x112   : > { %p503_p10 = scmp.lt.u32.totalorder %s501_s30, %s497_s27  ;;  %p505_p12 = scmp.lt.u32.totalorder %s497_s27, %s664_s19 }
 0x113   : > { %p499_p7 = pnand %p498_p4, %p610_p5 }
 0x114   : > { %p504_p11 = por %p503_p10, %p502_p9 }
 0x115   : > { %p500_p8 = pneg %p499_p7 }
 0x116   : > { %p506_p13 = por %p505_p12, %p504_p11 }
 0x118   : > { %p507_p0 = pnand %p506_p13, %p500_p8 }
 0x11a   : > { %510 = shalt.err (!%p507_p0)
}
 0x11b   : > { %s550_s6 = smov 128   ;;  %s551_s7 = smov 8  }
 0x11c   : > { %427 = dma.vmem_to_hbm [thread:$0]  (%p610_p5), %s659_s10, 256, %s664_s19, %s666_s20, %s550_s6, %s550_s6, %s551_s7  }
 0x11d PF: > { %p433_p1 = scmp.ge.s32.totalorder %s545_s15, 2  ;;  %s351_s8 = sand.u32 1, %s533_s12  }
 0x11e   : > { %s352_s11 = scalar_lea.sflag [#allocation3], %s351_s8 }
 0x11f   : > { %p430_p2 = pnand %p433_p1, %p614_p6 }
 0x121   : > { %528 = dma.done.wait (!%p430_p2), %s352_s11, 256  }
 0x122   : > { %530 = vsyncadd (!%p430_p2), %s352_s11, 4294967040  ;;  %p13_p3 = scmp.ge.s32.totalorder %s597_s18, 4   ;;  %s713_s12 = smov %s537_s13 }
 0x123   : > { %s714_s13 = smov %s541_s14  ;;  %s715_s14 = smov %s608_s21 }
 0x124   : > { %s716_s15 = smov %s597_s18  ;;  %15 = sbr.rel (!%p13_p3) target bundleno = 3 (0x3), region = 67 }
 0x12b   :  { %357 = vsyncpa [#allocation3], 1 }
 0x12c   :  { %359 = vsyncpa [#allocation3 + $0x1], 1 }

</bundles_post_ra>
